<compile_context>
chip_gen: v7x
topology: tpu7x:2x2x1
jax: 0.10.0
libtpu: 0.0.40
codegen_flags: <defaults>
</compile_context>

<pallas_src>
import jax
import jax.numpy as jnp
from jax.experimental import pallas as pl
from jax.experimental.pallas import tpu as pltpu


def _resblock_kernel(x_ref, w1_ref, b1_ref, w2_ref, b2_ref, o_ref):
    """Fused 1x1 conv -> ReLU -> 1x1 conv -> residual add (spatial on lanes).

    x_ref : (N, Cin, TS)  VMEM   spatial tile on the lane axis (lane-dense)
    w1_ref: (Chid, Cin)   VMEM   == conv1.weight[:, :, 0, 0]
    b1_ref: (Chid, 1)     VMEM
    w2_ref: (Cin, Chid)   VMEM   == conv2.weight[:, :, 0, 0]
    b2_ref: (Cin, 1)      VMEM
    o_ref : (N, Cin, TS)  VMEM
    """
    x = x_ref[...].astype(jnp.float32)      # (N, Cin, TS)
    w1 = w1_ref[...].astype(jnp.float32)    # (Chid, Cin)
    w2 = w2_ref[...].astype(jnp.float32)    # (Cin, Chid)
    b1 = b1_ref[...].astype(jnp.float32)    # (Chid, 1) -> lane-broadcast
    b2 = b2_ref[...].astype(jnp.float32)    # (Cin, 1)

    # conv1 + ReLU: h[n, o, s] = relu(sum_c w1[o, c] * x[n, c, s] + b1[o])
    # With Cin=4 / Chid=8, an MXU pass would be nearly empty; do the channel
    # contraction on the VPU (broadcast multiply) + a short sublane reduce,
    # keeping the weights resident in a couple of vregs.
    h = jnp.sum(w1[None, :, :, None] * x[:, None, :, :], axis=2)   # (N, Chid, TS)
    h = jnp.maximum(h + b1[None, :, :], 0.0)

    # conv2 + bias + residual: y[n,c,s] = sum_o w2[c,o]*h[n,o,s] + b2[c] + x[n,c,s]
    y = jnp.sum(w2[None, :, :, None] * h[:, None, :, :], axis=2)   # (N, Cin, TS)
    y = y + b2[None, :, :] + x

    # Single lane-dense store of the whole (N, Cin, TS) tile (no masked vst).
    o_ref[...] = y.astype(o_ref.dtype)


def residual_block(x_nchw, w1, b1, w2, b2, *, spatial_tile=None):
    """x_nchw: (N, Cin, H, W). w1: (Chid, Cin), b1: (Chid,), w2: (Cin, Chid), b2: (Cin,).

    Weight orientation is PyTorch-native (conv.weight[:, :, 0, 0]).
    """
    N, C, H, W = x_nchw.shape
    Chid = w1.shape[0]
    assert w1.shape == (Chid, C) and w2.shape == (C, Chid)
    assert b1.shape == (Chid,) and b2.shape == (C,)
    S = H * W

    # NCHW -> (N, C, H*W): contiguous reshape, no transpose / extra HBM pass.
    x3 = x_nchw.reshape(N, C, S)
    b1c = b1.reshape(Chid, 1)
    b2c = b2.reshape(C, 1)

    # Spatial tile: keep the lane axis dense (multiple of 128, or the full H*W)
    # and the grid as shallow as the problem allows; the demo (S=256) is a
    # single grid step.
    # TODO(synk): for very large N*H*W (esp. on v7x with 2 TCs / 64 MiB VMEM),
    # also tile N and pick tiles so each core gets >=4-8 grid steps to pipeline.
    if spatial_tile is None:
        ts = S if (S <= 8192 or S % 2048 != 0) else 2048
    else:
        ts = spatial_tile
    assert S % ts == 0 and (ts == S or ts % 128 == 0), "spatial tile must be lane-dense"
    grid = (S // ts,)

    out = pl.pallas_call(
        _resblock_kernel,
        out_shape=jax.ShapeDtypeStruct((N, C, S), x_nchw.dtype),
        grid_spec=pltpu.PrefetchScalarGridSpec(
            num_scalar_prefetch=0,
            grid=grid,
            in_specs=[
                pl.BlockSpec((N, C, ts), lambda j: (0, 0, j)),   # x spatial tile
                pl.BlockSpec((Chid, C), lambda j: (0, 0)),       # W1 (resident)
                pl.BlockSpec((Chid, 1), lambda j: (0, 0)),       # b1
                pl.BlockSpec((C, Chid), lambda j: (0, 0)),       # W2 (resident)
                pl.BlockSpec((C, 1), lambda j: (0, 0)),          # b2
            ],
            out_specs=pl.BlockSpec((N, C, ts), lambda j: (0, 0, j)),
        ),
        compiler_params=pltpu.CompilerParams(
            dimension_semantics=("parallel",),   # spatial tiles are independent
        ),
    )(x3, w1, b1c, w2, b2c)

    # (N, C, H*W) -> NCHW: contiguous reshape back.
    return out.reshape(N, C, H, W)


if __name__ == "__main__":
    # Small shapes consistent with the module: batch=2, in_channels=4,
    # hidden_channels=8, spatial=16x16.
    N, Cin, Chid, Hs, Ws = 2, 4, 8, 16, 16

    key = jax.random.PRNGKey(0)
    kx, kw1, kb1, kw2, kb2 = jax.random.split(key, 5)

    x = jax.random.normal(kx, (N, Cin, Hs, Ws), dtype=jnp.float32)

    # Deterministic parameter init (PyTorch-like uniform bounds for Conv2d k=1),
    # stored in PyTorch-native orientation: conv.weight[:, :, 0, 0].
    bound1 = 1.0 / (Cin ** 0.5)
    bound2 = 1.0 / (Chid ** 0.5)
    w1 = jax.random.uniform(kw1, (Chid, Cin), jnp.float32, -bound1, bound1)
    b1 = jax.random.uniform(kb1, (Chid,), jnp.float32, -bound1, bound1)
    w2 = jax.random.uniform(kw2, (Cin, Chid), jnp.float32, -bound2, bound2)
    b2 = jax.random.uniform(kb2, (Cin,), jnp.float32, -bound2, bound2)

    out = jax.block_until_ready(residual_block(x, w1, b1, w2, b2))

    # Pure-JAX reference of the same math (1x1 conv == channel contraction).
    ref = jnp.einsum("oc,nchw->nohw", w1, x) + b1[None, :, None, None]
    ref = jnp.maximum(ref, 0.0)
    ref = jnp.einsum("co,nohw->nchw", w2, ref) + b2[None, :, None, None] + x

    assert out.shape == x.shape
    assert jnp.allclose(out, ref, atol=1e-5, rtol=1e-5), "mismatch vs reference"

    print("KERNEL_OK")
</pallas_src>

<mosaic_0001>
module attributes {stable_mosaic.version = 11 : i64} {
  func.func @_resblock_kernel(%arg0: i32, %arg1: memref<2x4x256xf32, #tpu.memory_space<vmem>>, %arg2: memref<8x4xf32, #tpu.memory_space<vmem>>, %arg3: memref<8x1xf32, #tpu.memory_space<vmem>>, %arg4: memref<4x8xf32, #tpu.memory_space<vmem>>, %arg5: memref<4x1xf32, #tpu.memory_space<vmem>>, %arg6: memref<2x4x256xf32, #tpu.memory_space<vmem>>) attributes {dimension_semantics = [#tpu.dimension_semantics<parallel>], iteration_bounds = array<i64: 1>, scalar_prefetch = 0 : i64, scratch_operands = 0 : i64, tpu.core_type = #tpu.core_type<tc>, window_params = [{transform_indices = @transform_0, window_bounds = array<i64: 2, 4, 256>}, {pipeline_mode = #tpu.pipeline_mode<synchronous>, transform_indices = @transform_1, window_bounds = array<i64: 8, 4>}, {pipeline_mode = #tpu.pipeline_mode<synchronous>, transform_indices = @transform_2, window_bounds = array<i64: 8, 1>}, {pipeline_mode = #tpu.pipeline_mode<synchronous>, transform_indices = @transform_3, window_bounds = array<i64: 4, 8>}, {pipeline_mode = #tpu.pipeline_mode<synchronous>, transform_indices = @transform_4, window_bounds = array<i64: 4, 1>}, {transform_indices = @transform_5, window_bounds = array<i64: 2, 4, 256>}]} {
    %c0 = arith.constant 0 : index
    %c0_0 = arith.constant 0 : index
    %c0_1 = arith.constant 0 : index
    %0 = vector.load %arg1[%c0, %c0_0, %c0_1] : memref<2x4x256xf32, #tpu.memory_space<vmem>>, vector<2x4x256xf32>
    %c0_2 = arith.constant 0 : index
    %c0_3 = arith.constant 0 : index
    %1 = vector.load %arg2[%c0_2, %c0_3] : memref<8x4xf32, #tpu.memory_space<vmem>>, vector<8x4xf32>
    %c0_4 = arith.constant 0 : index
    %c0_5 = arith.constant 0 : index
    %2 = vector.load %arg4[%c0_4, %c0_5] : memref<4x8xf32, #tpu.memory_space<vmem>>, vector<4x8xf32>
    %c0_6 = arith.constant 0 : index
    %c0_7 = arith.constant 0 : index
    %3 = vector.load %arg3[%c0_6, %c0_7] : memref<8x1xf32, #tpu.memory_space<vmem>>, vector<8x1xf32>
    %c0_8 = arith.constant 0 : index
    %c0_9 = arith.constant 0 : index
    %4 = vector.load %arg5[%c0_8, %c0_9] : memref<4x1xf32, #tpu.memory_space<vmem>>, vector<4x1xf32>
    %5 = vector.shape_cast %1 : vector<8x4xf32> to vector<1x8x4x1xf32>
    %6 = vector.shape_cast %0 : vector<2x4x256xf32> to vector<2x1x4x256xf32>
    %7 = vector.broadcast %5 : vector<1x8x4x1xf32> to vector<2x8x4x256xf32>
    %8 = vector.broadcast %6 : vector<2x1x4x256xf32> to vector<2x8x4x256xf32>
    %9 = arith.mulf %7, %8 : vector<2x8x4x256xf32>
    %cst = arith.constant dense<0.000000e+00> : vector<2x8x256xf32>
    %10 = vector.multi_reduction <add>, %9, %cst [2] : vector<2x8x4x256xf32> to vector<2x8x256xf32>
    %11 = vector.shape_cast %3 : vector<8x1xf32> to vector<1x8x1xf32>
    %12 = vector.broadcast %11 : vector<1x8x1xf32> to vector<2x8x256xf32>
    %13 = arith.addf %10, %12 : vector<2x8x256xf32>
    %cst_10 = arith.constant 0.000000e+00 : f32
    %14 = vector.broadcast %cst_10 : f32 to vector<2x8x256xf32>
    %15 = arith.maximumf %13, %14 : vector<2x8x256xf32>
    %16 = vector.shape_cast %2 : vector<4x8xf32> to vector<1x4x8x1xf32>
    %17 = vector.shape_cast %15 : vector<2x8x256xf32> to vector<2x1x8x256xf32>
    %18 = vector.broadcast %16 : vector<1x4x8x1xf32> to vector<2x4x8x256xf32>
    %19 = vector.broadcast %17 : vector<2x1x8x256xf32> to vector<2x4x8x256xf32>
    %20 = arith.mulf %18, %19 : vector<2x4x8x256xf32>
    %cst_11 = arith.constant dense<0.000000e+00> : vector<2x4x256xf32>
    %21 = vector.multi_reduction <add>, %20, %cst_11 [2] : vector<2x4x8x256xf32> to vector<2x4x256xf32>
    %22 = vector.shape_cast %4 : vector<4x1xf32> to vector<1x4x1xf32>
    %23 = vector.broadcast %22 : vector<1x4x1xf32> to vector<2x4x256xf32>
    %24 = arith.addf %21, %23 : vector<2x4x256xf32>
    %25 = arith.addf %24, %0 : vector<2x4x256xf32>
    %c0_12 = arith.constant 0 : index
    %c0_13 = arith.constant 0 : index
    %c0_14 = arith.constant 0 : index
    %26 = vector.load %arg6[%c0_12, %c0_13, %c0_14] : memref<2x4x256xf32, #tpu.memory_space<vmem>>, vector<2x4x256xf32>
    tpu.vector_store %arg6[%c0_12, %c0_13, %c0_14], %25 {strides = array<i32>} : memref<2x4x256xf32, #tpu.memory_space<vmem>>, vector<2x4x256xf32>,
    return
  }
  func.func @transform_0(%arg0: i32) -> (i32, i32, i32) {
    %c0_i32 = arith.constant 0 : i32
    %c0_i32_0 = arith.constant 0 : i32
    %c0_i32_1 = arith.constant 0 : i32
    return %c0_i32, %c0_i32_0, %arg0 : i32, i32, i32
  }
  func.func @transform_1(%arg0: i32) -> (i32, i32) {
    %c0_i32 = arith.constant 0 : i32
    %c0_i32_0 = arith.constant 0 : i32
    %c0_i32_1 = arith.constant 0 : i32
    return %c0_i32, %c0_i32_0 : i32, i32
  }
  func.func @transform_2(%arg0: i32) -> (i32, i32) {
    %c0_i32 = arith.constant 0 : i32
    %c0_i32_0 = arith.constant 0 : i32
    %c0_i32_1 = arith.constant 0 : i32
    return %c0_i32, %c0_i32_0 : i32, i32
  }
  func.func @transform_3(%arg0: i32) -> (i32, i32) {
    %c0_i32 = arith.constant 0 : i32
    %c0_i32_0 = arith.constant 0 : i32
    %c0_i32_1 = arith.constant 0 : i32
    return %c0_i32, %c0_i32_0 : i32, i32
  }
  func.func @transform_4(%arg0: i32) -> (i32, i32) {
    %c0_i32 = arith.constant 0 : i32
    %c0_i32_0 = arith.constant 0 : i32
    %c0_i32_1 = arith.constant 0 : i32
    return %c0_i32, %c0_i32_0 : i32, i32
  }
  func.func @transform_5(%arg0: i32) -> (i32, i32, i32) {
    %c0_i32 = arith.constant 0 : i32
    %c0_i32_0 = arith.constant 0 : i32
    %c0_i32_1 = arith.constant 0 : i32
    return %c0_i32, %c0_i32_0, %arg0 : i32, i32, i32
  }
}

</mosaic_0001>

<bundles_post_ra>
// kernel: tpu_custom_call.1
= control target key start
LH: loop header
LB: loop body
LE: loop exit
PB: predicated region body
PF: predicated region fallthrough
CT: control target
= control target key end

     0   :  { %v27_v0 = vlaneseq  ;;  %v832_v1 = vmov 0   ;;  %s1267_s0 = inlined_call_operand.vmem [shape: f32[2,4,256], index: 0, kind: input, shape index: {}]   ;;  %s1268_s1 = inlined_call_operand.vmem [shape: f32[8,4], index: 1, kind: input, shape index: {}]   ;;  %s1269_s2 = inlined_call_operand.vmem [shape: f32[8,1], index: 2, kind: input, shape index: {}]   ;;  %s1270_s3 = inlined_call_operand.vmem [shape: f32[4,8], index: 3, kind: input, shape index: {}]   ;;  %s1271_s4 = inlined_call_operand.vmem [shape: f32[4,1], index: 4, kind: input, shape index: {}]   ;;  %s1272_s5 = inlined_call_operand.hbm [shape: f32[2,4,256], index: 5, kind: output, shape index: {}]  }
   0x1   :  { %803 = vset.pattern.permute.xlu0 %v832_v1 }
   0x2   :  { %v28_v2 = vshrl.u32 %v27_v0, 7 }
   0x3   :  { %10 = vsyncpa [#allocation3], 0  ;;  %v23_v3 = vld [vmem:[%s1268_s1] sm:$0xff]  ;;  %v886_v28 = vld [vmem:[%s1267_s0 + $0x8] sm:$0xff]  ;;  %vm121_vm0 = vcmask 1043456   ;;  %vm490_vm1 = vcmask 1041409  }
   0x4   :  { %v36_v4 = vsub.s32 1, %v28_v2  ;;  %v43_v5 = vsub.s32 2, %v28_v2  ;;  %v29_v6 = vsub.s32 0, %v28_v2  ;;  %v50_v7 = vsub.s32 3, %v28_v2  ;;  %v24_v20 = vld [vmem:[%s1270_s3] sm:$0xf] }
   0x5   :  { %v57_v11 = vsub.s32 4, %v28_v2  ;;  %v64_v13 = vsub.s32 5, %v28_v2  ;;  %v71_v15 = vsub.s32 6, %v28_v2  ;;  %v78_v17 = vsub.s32 7, %v28_v2  ;;  %v25_v22 = vld [vmem:[%s1269_s2] sm:$0xff] }
   0x6   :  { %v37_v8 = vrot.slane %v23_v3, %v36_v4  ;;  %v30_v9 = vrot.slane %v23_v3, %v29_v6  ;;  %v44_v10 = vrot.slane %v23_v3, %v43_v5  ;;  %v51_v12 = vrot.slane %v23_v3, %v50_v7  ;;  %v26_v26 = vld [vmem:[%s1271_s4] sm:$0xf] }
   0x7   :  { %v58_v14 = vrot.slane %v23_v3, %v57_v11  ;;  %v65_v16 = vrot.slane %v23_v3, %v64_v13  ;;  %v72_v18 = vrot.slane %v23_v3, %v71_v15  ;;  %v79_v19 = vrot.slane %v23_v3, %v78_v17  ;;  %v881_v27 = vld [vmem:[%s1267_s0] sm:$0xff] }
   0x8   :  { %39 = vbcast.lane.b32.xlu0 %v37_v8, 256  ;;  %32 = vbcast.lane.b32.xlu1 %v30_v9, 256  ;;  %v439_v21 = vrot.slane %v24_v20, %v36_v4  ;;  %v446_v23 = vrot.slane %v24_v20, %v43_v5  ;;  %v432_v24 = vrot.slane %v24_v20, %v29_v6  ;;  %vm493_vm2 = vcmask 1042434  }
   0x9   :  { %v453_v25 = vrot.slane %v24_v20, %v50_v7  ;;  %v890_v29 = vcombine.high %v881_v27, %v881_v27  ;;  %v894_v30 = vcombine.high %v886_v28, %v886_v28  ;;  %vm496_vm3 = vcmask 1043459  }
   0xa   :  { %vm499_vm4 = vcmask 1044484   ;;  %vm502_vm5 = vcmask 1045509   ;;  %vm505_vm6 = vcmask 1046534   ;;  %vm508_vm7 = vcmask 1047559  }
   0xc   :  { %46 = vbcast.lane.b32.xlu0 %v44_v10, 256  ;;  %53 = vbcast.lane.b32.xlu1 %v51_v12, 256 }
  0x10   :  { %60 = vbcast.lane.b32.xlu0 %v58_v14, 256  ;;  %67 = vbcast.lane.b32.xlu1 %v65_v16, 256 }
  0x14   :  { %74 = vbcast.lane.b32.xlu0 %v72_v18, 256  ;;  %81 = vbcast.lane.b32.xlu1 %v79_v19, 256 }
  0x18   :  { %348 = vperm.xlu0 %803, %v25_v22   ;;  %441 = vbcast.lane.b32.xlu1 %v439_v21, 256 }
  0x1c   :  { %448 = vbcast.lane.b32.xlu0 %v446_v23, 256  ;;  %434 = vbcast.lane.b32.xlu1 %v432_v24, 256 }
  0x20   :  { %670 = vperm.xlu0 %803, %v26_v26   ;;  %455 = vbcast.lane.b32.xlu1 %v453_v25, 256 }
  0x7a   :  { %v40_v31 = vpop.permute.xlu0 %39  ;;  %v33_v32 = vpop.permute.xlu1 %32 }
  0x7b   :  { %v91_v35 = vmul.f32 %v40_v31, %v881_v27  ;;  %v92_v36 = vmul.f32 %v890_v29, %v40_v31  ;;  %v107_v37 = vmul.f32 %v40_v31, %v886_v28  ;;  %v108_v38 = vmul.f32 %v894_v30, %v40_v31 }
  0x7c   :  { %v89_v39 = vmul.f32 %v33_v32, %v881_v27  ;;  %v90_v40 = vmul.f32 %v890_v29, %v33_v32  ;;  %v105_v41 = vmul.f32 %v33_v32, %v886_v28  ;;  %v106_v42 = vmul.f32 %v894_v30, %v33_v32 }
  0x7d   :  { %v136_v43 = vsel %vm121_vm0, %v91_v35, 0.0  ;;  %v143_v44 = vsel %vm121_vm0, %v92_v36, 0.0  ;;  %v248_v45 = vsel %vm121_vm0, %v107_v37, 0.0  ;;  %v255_v46 = vsel %vm121_vm0, %v108_v38, 0.0 }
  0x7e   :  { %v137_v47 = vrot.slane %v136_v43, 4  ;;  %v144_v48 = vrot.slane %v143_v44, 4  ;;  %v249_v49 = vrot.slane %v248_v45, 4  ;;  %v256_v50 = vrot.slane %v255_v46, 4  ;;  %v47_v51 = vpop.permute.xlu0 %46 }
  0x7f   :  { %v93_v52 = vmul.f32 %v47_v51, %v881_v27  ;;  %v94_v53 = vmul.f32 %v890_v29, %v47_v51  ;;  %v109_v54 = vmul.f32 %v47_v51, %v886_v28  ;;  %v110_v55 = vmul.f32 %v894_v30, %v47_v51 }
  0x80   :  { %v138_v56 = vadd.f32 %v137_v47, %v136_v43  ;;  %v145_v57 = vadd.f32 %v144_v48, %v143_v44  ;;  %v250_v58 = vadd.f32 %v249_v49, %v248_v45  ;;  %v257_v59 = vadd.f32 %v256_v50, %v255_v46 }
  0x81   :  { %v150_v60 = vsel %vm121_vm0, %v93_v52, 0.0  ;;  %v157_v61 = vsel %vm121_vm0, %v94_v53, 0.0  ;;  %v262_v62 = vsel %vm121_vm0, %v109_v54, 0.0  ;;  %v269_v63 = vsel %vm121_vm0, %v110_v55, 0.0 }
  0x82   :  { %v139_v0 = vrot.slane %v138_v56, 2  ;;  %v146_v1 = vrot.slane %v145_v57, 2  ;;  %v251_v2 = vrot.slane %v250_v58, 2  ;;  %v258_v3 = vrot.slane %v257_v59, 2  ;;  %v61_v54 = vpop.permute.xlu0 %60 }
  0x83   :  { %v151_v4 = vrot.slane %v150_v60, 4  ;;  %v158_v5 = vrot.slane %v157_v61, 4  ;;  %v263_v6 = vrot.slane %v262_v62, 4  ;;  %v270_v7 = vrot.slane %v269_v63, 4 }
  0x84   :  { %v140_v8 = vadd.f32 %v139_v0, %v138_v56  ;;  %v147_v9 = vadd.f32 %v146_v1, %v145_v57  ;;  %v252_v10 = vadd.f32 %v251_v2, %v250_v58  ;;  %v259_v11 = vadd.f32 %v258_v3, %v257_v59 }
  0x85   :  { %v152_v12 = vadd.f32 %v151_v4, %v150_v60  ;;  %v159_v13 = vadd.f32 %v158_v5, %v157_v61  ;;  %v264_v14 = vadd.f32 %v263_v6, %v262_v62  ;;  %v271_v15 = vadd.f32 %v270_v7, %v269_v63 }
  0x86   :  { %v141_v16 = vrot.slane %v140_v8, 1  ;;  %v148_v17 = vrot.slane %v147_v9, 1  ;;  %v253_v18 = vrot.slane %v252_v10, 1  ;;  %v260_v19 = vrot.slane %v259_v11, 1 }
  0x87   :  { %v153_v20 = vrot.slane %v152_v12, 2  ;;  %v160_v21 = vrot.slane %v159_v13, 2  ;;  %v265_v22 = vrot.slane %v264_v14, 2  ;;  %v272_v23 = vrot.slane %v271_v15, 2 }
  0x88   :  { %v918_v24 = vadd.f32 %v141_v16, %v140_v8  ;;  %v920_v25 = vadd.f32 %v148_v17, %v147_v9  ;;  %v922_v26 = vadd.f32 %v253_v18, %v252_v10  ;;  %v924_v31 = vadd.f32 %v260_v19, %v259_v11 }
  0x89   :  { %v154_v32 = vadd.f32 %v153_v20, %v152_v12  ;;  %v161_v35 = vadd.f32 %v160_v21, %v159_v13  ;;  %v266_v36 = vadd.f32 %v265_v22, %v264_v14  ;;  %v273_v37 = vadd.f32 %v272_v23, %v271_v15  ;;  %v54_v23 = vpop.permute.xlu1 %53 }
  0x8a   :  { %v122_v38 = vsel %vm121_vm0, %v89_v39, 0.0  ;;  %v129_v43 = vsel %vm121_vm0, %v90_v40, 0.0  ;;  %v234_v44 = vsel %vm121_vm0, %v105_v41, 0.0  ;;  %v241_v45 = vsel %vm121_vm0, %v106_v42, 0.0 }
  0x8b   :  { %v155_v46 = vrot.slane %v154_v32, 1  ;;  %v162_v47 = vrot.slane %v161_v35, 1  ;;  %v267_v48 = vrot.slane %v266_v36, 1  ;;  %v274_v49 = vrot.slane %v273_v37, 1 }
  0x8c   :  { %v123_v50 = vrot.slane %v122_v38, 4  ;;  %v130_v51 = vrot.slane %v129_v43, 4  ;;  %v235_v52 = vrot.slane %v234_v44, 4  ;;  %v242_v53 = vrot.slane %v241_v45, 4 }
  0x8d   :  { %v930_v55 = vadd.f32 %v155_v46, %v154_v32  ;;  %v932_v56 = vadd.f32 %v162_v47, %v161_v35  ;;  %v934_v39 = vadd.f32 %v267_v48, %v266_v36  ;;  %v936_v40 = vadd.f32 %v274_v49, %v273_v37 }
  0x8e   :  { %v124_v41 = vadd.f32 %v123_v50, %v122_v38  ;;  %v131_v57 = vadd.f32 %v130_v51, %v129_v43  ;;  %v236_v42 = vadd.f32 %v235_v52, %v234_v44  ;;  %v243_v58 = vadd.f32 %v242_v53, %v241_v45 }
  0x8f   :  { %v97_v59 = vmul.f32 %v61_v54, %v881_v27  ;;  %v98_v60 = vmul.f32 %v890_v29, %v61_v54  ;;  %v113_v61 = vmul.f32 %v61_v54, %v886_v28  ;;  %v114_v62 = vmul.f32 %v894_v30, %v61_v54 }
  0x90   :  { %v125_v63 = vrot.slane %v124_v41, 2  ;;  %v132_v0 = vrot.slane %v131_v57, 2  ;;  %v237_v1 = vrot.slane %v236_v42, 2  ;;  %v244_v2 = vrot.slane %v243_v58, 2 }
  0x91   :  { %v178_v3 = vsel %vm121_vm0, %v97_v59, 0.0  ;;  %v185_v4 = vsel %vm121_vm0, %v98_v60, 0.0  ;;  %v290_v5 = vsel %vm121_vm0, %v113_v61, 0.0  ;;  %v297_v6 = vsel %vm121_vm0, %v114_v62, 0.0 }
  0x92   :  { %v126_v7 = vadd.f32 %v125_v63, %v124_v41  ;;  %v133_v8 = vadd.f32 %v132_v0, %v131_v57  ;;  %v238_v9 = vadd.f32 %v237_v1, %v236_v42  ;;  %v245_v10 = vadd.f32 %v244_v2, %v243_v58  ;;  %v75_v2 = vpop.permute.xlu0 %74 }
  0x93   :  { %v179_v11 = vrot.slane %v178_v3, 4  ;;  %v186_v12 = vrot.slane %v185_v4, 4  ;;  %v291_v13 = vrot.slane %v290_v5, 4  ;;  %v298_v14 = vrot.slane %v297_v6, 4 }
  0x94   :  { %v127_v15 = vrot.slane %v126_v7, 1  ;;  %v134_v16 = vrot.slane %v133_v8, 1  ;;  %v239_v17 = vrot.slane %v238_v9, 1  ;;  %v246_v18 = vrot.slane %v245_v10, 1 }
  0x95   :  { %v180_v19 = vadd.f32 %v179_v11, %v178_v3  ;;  %v187_v20 = vadd.f32 %v186_v12, %v185_v4  ;;  %v292_v21 = vadd.f32 %v291_v13, %v290_v5  ;;  %v299_v22 = vadd.f32 %v298_v14, %v297_v6 }
  0x96   :  { %v946_v32 = vadd.f32 %v127_v15, %v126_v7  ;;  %v948_v35 = vadd.f32 %v134_v16, %v133_v8  ;;  %v950_v36 = vadd.f32 %v239_v17, %v238_v9  ;;  %v952_v37 = vadd.f32 %v246_v18, %v245_v10 }
  0x97   :  { %v181_v38 = vrot.slane %v180_v19, 2  ;;  %v188_v43 = vrot.slane %v187_v20, 2  ;;  %v293_v44 = vrot.slane %v292_v21, 2  ;;  %v300_v45 = vrot.slane %v299_v22, 2 }
  0x98   :  { %v95_v46 = vmul.f32 %v54_v23, %v881_v27  ;;  %v96_v47 = vmul.f32 %v890_v29, %v54_v23  ;;  %v111_v48 = vmul.f32 %v54_v23, %v886_v28  ;;  %v112_v49 = vmul.f32 %v894_v30, %v54_v23 }
  0x99   :  { %v182_v50 = vadd.f32 %v181_v38, %v180_v19  ;;  %v189_v51 = vadd.f32 %v188_v43, %v187_v20  ;;  %v294_v52 = vadd.f32 %v293_v44, %v292_v21  ;;  %v301_v53 = vadd.f32 %v300_v45, %v299_v22 }
  0x9a   :  { %v164_v54 = vsel %vm121_vm0, %v95_v46, 0.0  ;;  %v171_v41 = vsel %vm121_vm0, %v96_v47, 0.0  ;;  %v276_v57 = vsel %vm121_vm0, %v111_v48, 0.0  ;;  %v283_v42 = vsel %vm121_vm0, %v112_v49, 0.0 }
  0x9b   :  { %v183_v58 = vrot.slane %v182_v50, 1  ;;  %v190_v59 = vrot.slane %v189_v51, 1  ;;  %v295_v60 = vrot.slane %v294_v52, 1  ;;  %v302_v61 = vrot.slane %v301_v53, 1 }
  0x9c   :  { %v165_v62 = vrot.slane %v164_v54, 4  ;;  %v172_v63 = vrot.slane %v171_v41, 4  ;;  %v277_v0 = vrot.slane %v276_v57, 4  ;;  %v284_v1 = vrot.slane %v283_v42, 4 }
  0x9d   :  { %v962_v3 = vadd.f32 %v183_v58, %v182_v50  ;;  %v964_v4 = vadd.f32 %v190_v59, %v189_v51  ;;  %v966_v5 = vadd.f32 %v295_v60, %v294_v52  ;;  %v968_v6 = vadd.f32 %v302_v61, %v301_v53 }
  0x9e   :  { %v166_v7 = vadd.f32 %v165_v62, %v164_v54  ;;  %v173_v8 = vadd.f32 %v172_v63, %v171_v41  ;;  %v278_v9 = vadd.f32 %v277_v0, %v276_v57  ;;  %v285_v10 = vadd.f32 %v284_v1, %v283_v42  ;;  %v68_v42 = vpop.permute.xlu1 %67 }
  0x9f   :  { %v101_v11 = vmul.f32 %v75_v2, %v881_v27  ;;  %v102_v12 = vmul.f32 %v890_v29, %v75_v2  ;;  %v117_v13 = vmul.f32 %v75_v2, %v886_v28  ;;  %v118_v14 = vmul.f32 %v894_v30, %v75_v2 }
  0xa0   :  { %v167_v15 = vrot.slane %v166_v7, 2  ;;  %v174_v16 = vrot.slane %v173_v8, 2  ;;  %v279_v17 = vrot.slane %v278_v9, 2  ;;  %v286_v18 = vrot.slane %v285_v10, 2 }
  0xa1   :  { %v206_v19 = vsel %vm121_vm0, %v101_v11, 0.0  ;;  %v213_v20 = vsel %vm121_vm0, %v102_v12, 0.0  ;;  %v318_v21 = vsel %vm121_vm0, %v117_v13, 0.0  ;;  %v325_v22 = vsel %vm121_vm0, %v118_v14, 0.0 }
  0xa2   :  { %v168_v23 = vadd.f32 %v167_v15, %v166_v7  ;;  %v175_v38 = vadd.f32 %v174_v16, %v173_v8  ;;  %v280_v43 = vadd.f32 %v279_v17, %v278_v9  ;;  %v287_v44 = vadd.f32 %v286_v18, %v285_v10 }
  0xa3   :  { %v207_v45 = vrot.slane %v206_v19, 4  ;;  %v214_v46 = vrot.slane %v213_v20, 4  ;;  %v319_v47 = vrot.slane %v318_v21, 4  ;;  %v326_v48 = vrot.slane %v325_v22, 4 }
  0xa4   :  { %v169_v49 = vrot.slane %v168_v23, 1  ;;  %v176_v50 = vrot.slane %v175_v38, 1  ;;  %v281_v51 = vrot.slane %v280_v43, 1  ;;  %v288_v52 = vrot.slane %v287_v44, 1 }
  0xa5   :  { %v208_v53 = vadd.f32 %v207_v45, %v206_v19  ;;  %v215_v54 = vadd.f32 %v214_v46, %v213_v20  ;;  %v320_v41 = vadd.f32 %v319_v47, %v318_v21  ;;  %v327_v57 = vadd.f32 %v326_v48, %v325_v22 }
  0xa6   :  { %v978_v58 = vadd.f32 %v169_v49, %v168_v23  ;;  %v980_v59 = vadd.f32 %v176_v50, %v175_v38  ;;  %v982_v60 = vadd.f32 %v281_v51, %v280_v43  ;;  %v984_v61 = vadd.f32 %v288_v52, %v287_v44  ;;  %v82_v44 = vpop.permute.xlu1 %81 }
  0xa7   :  { %v209_v62 = vrot.slane %v208_v53, 2  ;;  %v216_v63 = vrot.slane %v215_v54, 2  ;;  %v321_v0 = vrot.slane %v320_v41, 2  ;;  %v328_v1 = vrot.slane %v327_v57, 2 }
  0xa8   :  { %v99_v2 = vmul.f32 %v68_v42, %v881_v27  ;;  %v100_v7 = vmul.f32 %v890_v29, %v68_v42  ;;  %v115_v8 = vmul.f32 %v68_v42, %v886_v28  ;;  %v116_v9 = vmul.f32 %v894_v30, %v68_v42 }
  0xa9   :  { %v210_v10 = vadd.f32 %v209_v62, %v208_v53  ;;  %v217_v11 = vadd.f32 %v216_v63, %v215_v54  ;;  %v322_v12 = vadd.f32 %v321_v0, %v320_v41  ;;  %v329_v13 = vadd.f32 %v328_v1, %v327_v57 }
  0xaa   :  { %v192_v14 = vsel %vm121_vm0, %v99_v2, 0.0  ;;  %v199_v15 = vsel %vm121_vm0, %v100_v7, 0.0  ;;  %v304_v16 = vsel %vm121_vm0, %v115_v8, 0.0  ;;  %v311_v17 = vsel %vm121_vm0, %v116_v9, 0.0 }
  0xab   :  { %v211_v18 = vrot.slane %v210_v10, 1  ;;  %v218_v19 = vrot.slane %v217_v11, 1  ;;  %v323_v20 = vrot.slane %v322_v12, 1  ;;  %v330_v21 = vrot.slane %v329_v13, 1 }
  0xac   :  { %v193_v22 = vrot.slane %v192_v14, 4  ;;  %v200_v23 = vrot.slane %v199_v15, 4  ;;  %v305_v38 = vrot.slane %v304_v16, 4  ;;  %v312_v43 = vrot.slane %v311_v17, 4 }
  0xad   :  { %v994_v45 = vadd.f32 %v211_v18, %v210_v10  ;;  %v996_v46 = vadd.f32 %v218_v19, %v217_v11  ;;  %v998_v47 = vadd.f32 %v323_v20, %v322_v12  ;;  %v1000_v48 = vadd.f32 %v330_v21, %v329_v13 }
  0xae   :  { %v194_v49 = vadd.f32 %v193_v22, %v192_v14  ;;  %v201_v50 = vadd.f32 %v200_v23, %v199_v15  ;;  %v306_v51 = vadd.f32 %v305_v38, %v304_v16  ;;  %v313_v52 = vadd.f32 %v312_v43, %v311_v17  ;;  %v349_v43 = vpop.permute.xlu0 %348 }
  0xaf   :  { %v103_v53 = vmul.f32 %v82_v44, %v881_v27  ;;  %v104_v54 = vmul.f32 %v890_v29, %v82_v44  ;;  %v119_v41 = vmul.f32 %v82_v44, %v886_v28  ;;  %v120_v57 = vmul.f32 %v894_v30, %v82_v44 }
  0xb0   :  { %v195_v42 = vrot.slane %v194_v49, 2  ;;  %v202_v62 = vrot.slane %v201_v50, 2  ;;  %v307_v63 = vrot.slane %v306_v51, 2  ;;  %v314_v0 = vrot.slane %v313_v52, 2 }
  0xb1   :  { %v220_v1 = vsel %vm121_vm0, %v103_v53, 0.0  ;;  %v227_v2 = vsel %vm121_vm0, %v104_v54, 0.0  ;;  %v332_v7 = vsel %vm121_vm0, %v119_v41, 0.0  ;;  %v339_v8 = vsel %vm121_vm0, %v120_v57, 0.0 }
  0xb2   :  { %v196_v9 = vadd.f32 %v195_v42, %v194_v49  ;;  %v203_v10 = vadd.f32 %v202_v62, %v201_v50  ;;  %v308_v11 = vadd.f32 %v307_v63, %v306_v51  ;;  %v315_v12 = vadd.f32 %v314_v0, %v313_v52 }
  0xb3   :  { %v221_v13 = vrot.slane %v220_v1, 4  ;;  %v228_v14 = vrot.slane %v227_v2, 4  ;;  %v333_v15 = vrot.slane %v332_v7, 4  ;;  %v340_v16 = vrot.slane %v339_v8, 4 }
  0xb4   :  { %v197_v17 = vrot.slane %v196_v9, 1  ;;  %v204_v18 = vrot.slane %v203_v10, 1  ;;  %v309_v19 = vrot.slane %v308_v11, 1  ;;  %v316_v20 = vrot.slane %v315_v12, 1 }
  0xb5   :  { %v222_v21 = vadd.f32 %v221_v13, %v220_v1  ;;  %v229_v22 = vadd.f32 %v228_v14, %v227_v2  ;;  %v334_v23 = vadd.f32 %v333_v15, %v332_v7  ;;  %v341_v38 = vadd.f32 %v340_v16, %v339_v8 }
  0xb6   :  { %v198_v44 = vadd.f32 %v197_v17, %v196_v9  ;;  %v205_v53 = vadd.f32 %v204_v18, %v203_v10  ;;  %v310_v54 = vadd.f32 %v309_v19, %v308_v11  ;;  %v317_v49 = vadd.f32 %v316_v20, %v315_v12 }
  0xb7   :  { %v223_v50 = vrot.slane %v222_v21, 2  ;;  %v230_v51 = vrot.slane %v229_v22, 2  ;;  %v335_v52 = vrot.slane %v334_v23, 2  ;;  %v342_v41 = vrot.slane %v341_v38, 2 }
  0xb8   :  { %v350_v57 = vrot.slane %v349_v43, 1  ;;  %v351_v42 = vrot.slane %v349_v43, 2  ;;  %v352_v62 = vrot.slane %v349_v43, 3  ;;  %v353_v63 = vrot.slane %v349_v43, 4 }
  0xb9   :  { %v224_v0 = vadd.f32 %v223_v50, %v222_v21  ;;  %v231_v34 = vadd.f32 %v230_v51, %v229_v22  ;;  %v336_v33 = vadd.f32 %v335_v52, %v334_v23  ;;  %v343_v1 = vadd.f32 %v342_v41, %v341_v38 }
  0xba   :  { %v354_v2 = vrot.slane %v349_v43, 5  ;;  %v355_v7 = vrot.slane %v349_v43, 6  ;;  %v356_v8 = vrot.slane %v349_v43, 7  ;;  %v1011_v9 = vadd.f32 %v349_v43, %v946_v32 }
  0xbb   :  { %v225_v10 = vrot.slane %v224_v0, 1  ;;  %v232_v11 = vrot.slane %v231_v34, 1  ;;  %v337_v12 = vrot.slane %v336_v33, 1  ;;  %v344_v13 = vrot.slane %v343_v1, 1 }
  0xbc   :  { %v1014_v14 = vadd.f32 %v349_v43, %v948_v35  ;;  %v1017_v15 = vadd.f32 %v350_v57, %v918_v24  ;;  %v1020_v16 = vadd.f32 %v350_v57, %v920_v25  ;;  %v1023_v17 = vadd.f32 %v351_v42, %v930_v55 }
  0xbd   :  { %v226_v18 = vadd.f32 %v225_v10, %v224_v0  ;;  %v233_v19 = vadd.f32 %v232_v11, %v231_v34  ;;  %v338_v32 = vadd.f32 %v337_v12, %v336_v33  ;;  %v345_v20 = vadd.f32 %v344_v13, %v343_v1 }
  0xbe   :  { %v1026_v21 = vadd.f32 %v351_v42, %v932_v56  ;;  %v1029_v22 = vadd.f32 %v352_v62, %v978_v58  ;;  %v1032_v35 = vadd.f32 %v352_v62, %v980_v59  ;;  %v1035_v24 = vadd.f32 %v353_v63, %v962_v3 }
  0xbf   :  { %v1038_v25 = vadd.f32 %v353_v63, %v964_v4  ;;  %v1040_v55 = vadd.f32 %v354_v2, %v198_v44  ;;  %v1042_v34 = vadd.f32 %v354_v2, %v205_v53  ;;  %v1045_v33 = vadd.f32 %v355_v7, %v994_v45 }
  0xc0   :  { %v1048_v56 = vadd.f32 %v355_v7, %v996_v46  ;;  %v1050_v58 = vadd.f32 %v356_v8, %v226_v18  ;;  %v1052_v59 = vadd.f32 %v356_v8, %v233_v19  ;;  %v1055_v3 = vadd.f32 %v349_v43, %v950_v36 }
  0xc1   :  { %v1058_v4 = vadd.f32 %v349_v43, %v952_v37  ;;  %v1061_v23 = vadd.f32 %v350_v57, %v922_v26  ;;  %v1064_v38 = vadd.f32 %v350_v57, %v924_v31  ;;  %v1067_v45 = vadd.f32 %v351_v42, %v934_v39 }
  0xc2   :  { %v1070_v46 = vadd.f32 %v351_v42, %v936_v40  ;;  %v1073_v44 = vadd.f32 %v352_v62, %v982_v60  ;;  %v1076_v36 = vadd.f32 %v352_v62, %v984_v61  ;;  %v1079_v37 = vadd.f32 %v353_v63, %v966_v5 }
  0xc3   :  { %v1082_v26 = vadd.f32 %v353_v63, %v968_v6  ;;  %v1084_v31 = vadd.f32 %v354_v2, %v310_v54  ;;  %v1086_v39 = vadd.f32 %v354_v2, %v317_v49  ;;  %v1089_v40 = vadd.f32 %v355_v7, %v998_v47 }
  0xc4   :  { %v1092_v60 = vadd.f32 %v355_v7, %v1000_v48  ;;  %v1094_v61 = vadd.f32 %v356_v8, %v338_v32  ;;  %v1096_v43 = vadd.f32 %v356_v8, %v345_v20  ;;  %v397_v5 = vmax.f32 %v1011_v9, 0.0 }
  0xc5   :  { %v398_v6 = vmax.f32 %v1014_v14, 0.0  ;;  %v399_v53 = vmax.f32 %v1017_v15, 0.0  ;;  %v400_v54 = vmax.f32 %v1020_v16, 0.0  ;;  %v401_v47 = vmax.f32 %v1023_v17, 0.0 }
  0xc6   :  { %v402_v49 = vmax.f32 %v1026_v21, 0.0  ;;  %v403_v48 = vmax.f32 %v1029_v22, 0.0  ;;  %v404_v50 = vmax.f32 %v1032_v35, 0.0  ;;  %v405_v51 = vmax.f32 %v1035_v24, 0.0 }
  0xc7   :  { %v406_v52 = vmax.f32 %v1038_v25, 0.0  ;;  %v407_v41 = vmax.f32 %v1040_v55, 0.0  ;;  %v408_v57 = vmax.f32 %v1042_v34, 0.0  ;;  %v409_v42 = vmax.f32 %v1045_v33, 0.0 }
  0xc8   :  { %v410_v62 = vmax.f32 %v1048_v56, 0.0  ;;  %v411_v63 = vmax.f32 %v1050_v58, 0.0  ;;  %v412_v0 = vmax.f32 %v1052_v59, 0.0  ;;  %v413_v1 = vmax.f32 %v1055_v3, 0.0 }
  0xc9   :  { %v414_v2 = vmax.f32 %v1058_v4, 0.0  ;;  %v415_v7 = vmax.f32 %v1061_v23, 0.0  ;;  %v416_v8 = vmax.f32 %v1064_v38, 0.0  ;;  %v417_v9 = vmax.f32 %v1067_v45, 0.0 }
  0xca   :  { %v418_v10 = vmax.f32 %v1070_v46, 0.0  ;;  %v419_v11 = vmax.f32 %v1073_v44, 0.0  ;;  %v420_v12 = vmax.f32 %v1076_v36, 0.0  ;;  %v421_v13 = vmax.f32 %v1079_v37, 0.0 }
  0xcb   :  { %v422_v14 = vmax.f32 %v1082_v26, 0.0  ;;  %v423_v15 = vmax.f32 %v1084_v31, 0.0  ;;  %v424_v16 = vmax.f32 %v1086_v39, 0.0  ;;  %v425_v17 = vmax.f32 %v1089_v40, 0.0 }
  0xcc   :  { %v426_v18 = vmax.f32 %v1092_v60, 0.0  ;;  %v427_v19 = vmax.f32 %v1094_v61, 0.0  ;;  %v428_v32 = vmax.f32 %v1096_v43, 0.0  ;;  %v489_v20 = vrot.slane %v399_v53, 7 }
  0xcd   :  { %v492_v21 = vrot.slane %v401_v47, 6  ;;  %v495_v22 = vrot.slane %v403_v48, 5  ;;  %v498_v35 = vrot.slane %v405_v51, 4  ;;  %v501_v24 = vrot.slane %v407_v41, 3 }
  0xce   :  { %v491_v25 = vsel %vm490_vm1, %v489_v20, %v397_v5  ;;  %v504_v55 = vrot.slane %v409_v42, 2  ;;  %v507_v34 = vrot.slane %v411_v63, 1  ;;  %v510_v33 = vrot.slane %v400_v54, 7 }
  0xcf   :  { %v494_v56 = vsel %vm493_vm2, %v492_v21, %v491_v25  ;;  %v512_v58 = vrot.slane %v402_v49, 6  ;;  %v514_v59 = vrot.slane %v404_v50, 5  ;;  %v516_v3 = vrot.slane %v406_v52, 4 }
  0xd0   :  { %v497_v23 = vsel %vm496_vm3, %v495_v22, %v494_v56  ;;  %v511_v38 = vsel %vm490_vm1, %v510_v33, %v398_v6  ;;  %v518_v45 = vrot.slane %v408_v57, 3  ;;  %v520_v46 = vrot.slane %v410_v62, 2 }
  0xd1   :  { %v500_v44 = vsel %vm499_vm4, %v498_v35, %v497_v23  ;;  %v513_v36 = vsel %vm493_vm2, %v512_v58, %v511_v38  ;;  %v522_v37 = vrot.slane %v412_v0, 1  ;;  %v524_v26 = vrot.slane %v415_v7, 7 }
  0xd2   :  { %v503_v31 = vsel %vm502_vm5, %v501_v24, %v500_v44  ;;  %v515_v39 = vsel %vm496_vm3, %v514_v59, %v513_v36  ;;  %v526_v40 = vrot.slane %v417_v9, 6  ;;  %v528_v60 = vrot.slane %v419_v11, 5  ;;  %v449_v9 = vpop.permute.xlu0 %448 }
  0xd3   :  { %v506_v61 = vsel %vm505_vm6, %v504_v55, %v503_v31  ;;  %v517_v43 = vsel %vm499_vm4, %v516_v3, %v515_v39  ;;  %v525_v5 = vsel %vm490_vm1, %v524_v26, %v413_v1  ;;  %v530_v6 = vrot.slane %v421_v13, 4 }
  0xd4   :  { %v1142_v53 = vsel %vm508_vm7, %v507_v34, %v506_v61  ;;  %v519_v54 = vsel %vm502_vm5, %v518_v45, %v517_v43  ;;  %v527_v47 = vsel %vm493_vm2, %v526_v40, %v525_v5  ;;  %v532_v49 = vrot.slane %v423_v15, 3 }
  0xd5   :  { %v521_v48 = vsel %vm505_vm6, %v520_v46, %v519_v54  ;;  %v529_v50 = vsel %vm496_vm3, %v528_v60, %v527_v47  ;;  %v534_v51 = vrot.slane %v425_v17, 2  ;;  %v536_v52 = vrot.slane %v427_v19, 1 }
  0xd6   :  { %v1149_v41 = vsel %vm508_vm7, %v522_v37, %v521_v48  ;;  %v531_v57 = vsel %vm499_vm4, %v530_v6, %v529_v50  ;;  %v538_v42 = vrot.slane %v416_v8, 7  ;;  %v540_v62 = vrot.slane %v418_v10, 6 }
  0xd7   :  { %v533_v63 = vsel %vm502_vm5, %v532_v49, %v531_v57  ;;  %v542_v0 = vrot.slane %v420_v12, 5  ;;  %v544_v1 = vrot.slane %v422_v14, 4  ;;  %v546_v7 = vrot.slane %v424_v16, 3  ;;  %v442_v14 = vpop.permute.xlu1 %441 }
  0xd8   :  { %v535_v11 = vsel %vm505_vm6, %v534_v51, %v533_v63  ;;  %v539_v13 = vsel %vm490_vm1, %v538_v42, %v414_v2  ;;  %v548_v15 = vrot.slane %v426_v18, 2  ;;  %v550_v17 = vrot.slane %v428_v32, 1  ;;  %v1176_v63 = vpop.permute.xlu0 %670 }
  0xd9   :  { %v1158_v19 = vsel %vm508_vm7, %v536_v52, %v535_v11  ;;  %v541_v8 = vsel %vm493_vm2, %v540_v62, %v539_v13  ;;  %v560_v10 = vmul.f32 %v1142_v53, %v449_v9  ;;  %v561_v12 = vmul.f32 %v1149_v41, %v449_v9 }
  0xda   :  { %v543_v16 = vsel %vm496_vm3, %v542_v0, %v541_v8  ;;  %v568_v20 = vmul.f32 %v1158_v19, %v449_v9  ;;  %v558_v4 = vmul.f32 %v1142_v53, %v442_v14  ;;  %v559_v2 = vmul.f32 %v1149_v41, %v442_v14 }
  0xdb   :  { %v545_v18 = vsel %vm499_vm4, %v544_v1, %v543_v16  ;;  %v596_v32 = vrot.slane %v560_v10, 4  ;;  %v602_v21 = vrot.slane %v561_v12, 4  ;;  %v566_v22 = vmul.f32 %v1158_v19, %v442_v14  ;;  %v435_v0 = vpop.permute.xlu1 %434 }
  0xdc   :  { %v547_v35 = vsel %vm502_vm5, %v546_v7, %v545_v18  ;;  %v644_v24 = vrot.slane %v568_v20, 4  ;;  %v584_v25 = vrot.slane %v558_v4, 4  ;;  %v590_v55 = vrot.slane %v559_v2, 4 }
  0xdd   :  { %v549_v34 = vsel %vm505_vm6, %v548_v15, %v547_v35  ;;  %v597_v33 = vadd.f32 %v596_v32, %v560_v10  ;;  %v603_v56 = vadd.f32 %v602_v21, %v561_v12  ;;  %v632_v58 = vrot.slane %v566_v22, 4 }
  0xde   :  { %v1172_v59 = vsel %vm508_vm7, %v550_v17, %v549_v34  ;;  %v645_v3 = vadd.f32 %v644_v24, %v568_v20  ;;  %v585_v23 = vadd.f32 %v584_v25, %v558_v4  ;;  %v591_v38 = vadd.f32 %v590_v55, %v559_v2 }
  0xdf   :  { %v569_v45 = vmul.f32 %v1172_v59, %v449_v9  ;;  %v598_v46 = vrot.slane %v597_v33, 2  ;;  %v604_v44 = vrot.slane %v603_v56, 2  ;;  %v567_v36 = vmul.f32 %v1172_v59, %v442_v14  ;;  %v456_v34 = vpop.permute.xlu1 %455 }
  0xe0   :  { %v646_v37 = vrot.slane %v645_v3, 2  ;;  %v586_v26 = vrot.slane %v585_v23, 2  ;;  %v592_v31 = vrot.slane %v591_v38, 2  ;;  %v633_v39 = vadd.f32 %v632_v58, %v566_v22 }
  0xe1   :  { %v599_v40 = vadd.f32 %v598_v46, %v597_v33  ;;  %v605_v60 = vadd.f32 %v604_v44, %v603_v56  ;;  %v650_v61 = vrot.slane %v569_v45, 4  ;;  %v638_v43 = vrot.slane %v567_v36, 4 }
  0xe2   :  { %v647_v5 = vadd.f32 %v646_v37, %v645_v3  ;;  %v587_v6 = vadd.f32 %v586_v26, %v585_v23  ;;  %v593_v54 = vadd.f32 %v592_v31, %v591_v38  ;;  %v634_v47 = vrot.slane %v633_v39, 2 }
  0xe3   :  { %v600_v49 = vrot.slane %v599_v40, 1  ;;  %v606_v48 = vrot.slane %v605_v60, 1  ;;  %v651_v50 = vadd.f32 %v650_v61, %v569_v45  ;;  %v639_v51 = vadd.f32 %v638_v43, %v567_v36 }
  0xe4   :  { %v648_v52 = vrot.slane %v647_v5, 1  ;;  %v588_v57 = vrot.slane %v587_v6, 1  ;;  %v594_v42 = vrot.slane %v593_v54, 1  ;;  %v635_v62 = vadd.f32 %v634_v47, %v633_v39 }
  0xe5   :  { %v601_v1 = vadd.f32 %v600_v49, %v599_v40  ;;  %v652_v7 = vrot.slane %v651_v50, 2  ;;  %v640_v9 = vrot.slane %v639_v51, 2  ;;  %v701_v11 = vrot.slane %v886_v28, 1 }
  0xe6   :  { %v607_v13 = vadd.f32 %v606_v48, %v605_v60  ;;  %v589_v15 = vadd.f32 %v588_v57, %v587_v6  ;;  %v595_v17 = vadd.f32 %v594_v42, %v593_v54  ;;  %v636_v8 = vrot.slane %v635_v62, 1 }
  0xe7   :  { %v649_v10 = vadd.f32 %v648_v52, %v647_v5  ;;  %v653_v12 = vadd.f32 %v652_v7, %v651_v50  ;;  %v641_v14 = vadd.f32 %v640_v9, %v639_v51  ;;  %v672_v16 = vrot.slane %v1176_v63, 1 }
  0xe8   :  { %v637_v20 = vadd.f32 %v636_v8, %v635_v62  ;;  %v1181_v4 = vrot.slane %v1176_v63, 2  ;;  %v556_v2 = vmul.f32 %v1142_v53, %v435_v0  ;;  %v557_v18 = vmul.f32 %v1149_v41, %v435_v0 }
  0xe9   :  { %v654_v32 = vrot.slane %v653_v12, 1  ;;  %v642_v21 = vrot.slane %v641_v14, 1  ;;  %v681_v28 = vadd.f32 %v672_v16, %v589_v15  ;;  %v682_v22 = vadd.f32 %v672_v16, %v595_v17 }
  0xea   :  { %v1186_v35 = vrot.slane %v1176_v63, 3  ;;  %v1189_v24 = vadd.f32 %v1181_v4, %v601_v1  ;;  %v689_v25 = vadd.f32 %v672_v16, %v637_v20  ;;  %v702_v55 = vrot.slane %v894_v30, 1 }
  0xeb   :  { %v655_v33 = vadd.f32 %v654_v32, %v653_v12  ;;  %v643_v56 = vadd.f32 %v642_v21, %v641_v14  ;;  %v1193_v58 = vadd.f32 %v1181_v4, %v607_v13  ;;  %v1196_v3 = vadd.f32 %v1181_v4, %v649_v10 }
  0xec   :  { %v1273_v23 = vrot.slane %v881_v27, 1  ;;  %v564_v45 = vmul.f32 %v1158_v19, %v435_v0  ;;  %v565_v46 = vmul.f32 %v1172_v59, %v435_v0  ;;  %v572_v44 = vrot.slane %v556_v2, 4 }
  0xed   :  { %v1274_v36 = vrot.slane %v890_v29, 1  ;;  %v1208_v26 = vadd.f32 %v701_v11, %v689_v25  ;;  %v578_v31 = vrot.slane %v557_v18, 4  ;;  %v562_v39 = vmul.f32 %v1142_v53, %v456_v34 }
  0xee   :  { %v1200_v38 = vadd.f32 %v1273_v23, %v681_v28  ;;  %v573_v40 = vadd.f32 %v572_v44, %v556_v2  ;;  %v620_v60 = vrot.slane %v564_v45, 4  ;;  %v626_v61 = vrot.slane %v565_v46, 4 }
  0xef   :  { %v1206_v37 = vadd.f32 %v1274_v36, %v682_v22  ;;  %v563_v27 = vmul.f32 %v1149_v41, %v456_v34  ;;  %v690_v43 = vadd.f32 %v672_v16, %v643_v56  ;;  %v579_v5 = vadd.f32 %v578_v31, %v557_v18 }
  0xf0   :  { %v570_v6 = vmul.f32 %v1158_v19, %v456_v34  ;;  %v571_v54 = vmul.f32 %v1172_v59, %v456_v34  ;;  %v574_v47 = vrot.slane %v573_v40, 2  ;;  %v621_v49 = vadd.f32 %v620_v60, %v564_v45 }
  0xf1   :  { %v627_v48 = vadd.f32 %v626_v61, %v565_v46  ;;  %v608_v50 = vrot.slane %v562_v39, 4  ;;  %v580_v51 = vrot.slane %v579_v5, 2  ;;  %v614_v52 = vrot.slane %v563_v27, 4 }
  0xf2   :  { %v656_v57 = vrot.slane %v570_v6, 4  ;;  %v662_v42 = vrot.slane %v571_v54, 4  ;;  %v575_v53 = vadd.f32 %v574_v47, %v573_v40  ;;  %v622_v62 = vrot.slane %v621_v49, 2 }
  0xf3   :  { %v628_v0 = vrot.slane %v627_v48, 2  ;;  %v609_v1 = vadd.f32 %v608_v50, %v562_v39  ;;  %v581_v7 = vadd.f32 %v580_v51, %v579_v5  ;;  %v615_v41 = vadd.f32 %v614_v52, %v563_v27 }
  0xf4   :  { %v657_v9 = vadd.f32 %v656_v57, %v570_v6  ;;  %v663_v11 = vadd.f32 %v662_v42, %v571_v54  ;;  %v576_v13 = vrot.slane %v575_v53, 1  ;;  %v623_v19 = vadd.f32 %v622_v62, %v621_v49  ;;  %v806_v6 = vld [vmem:[%s1267_s0] sm:$0xff] }
  0xf5   :  { %v629_v15 = vadd.f32 %v628_v0, %v627_v48  ;;  %v610_v59 = vrot.slane %v609_v1, 2  ;;  %v582_v17 = vrot.slane %v581_v7, 1  ;;  %v616_v8 = vrot.slane %v615_v41, 2 }
  0xf6   :  { %v658_v10 = vrot.slane %v657_v9, 2  ;;  %v664_v12 = vrot.slane %v663_v11, 2  ;;  %v577_v14 = vadd.f32 %v576_v13, %v575_v53  ;;  %v624_v16 = vrot.slane %v623_v19, 1 }
  0xf7   :  { %v630_v20 = vrot.slane %v629_v15, 1  ;;  %v611_v2 = vadd.f32 %v610_v59, %v609_v1  ;;  %v583_v18 = vadd.f32 %v582_v17, %v581_v7  ;;  %v617_v32 = vadd.f32 %v616_v8, %v615_v41 }
  0xf8   :  { %v659_v21 = vadd.f32 %v658_v10, %v657_v9  ;;  %v665_v28 = vadd.f32 %v664_v12, %v663_v11  ;;  %v625_v22 = vadd.f32 %v624_v16, %v623_v19  ;;  %v679_v34 = vadd.f32 %v1176_v63, %v577_v14 }
  0xf9   :  { %v631_v25 = vadd.f32 %v630_v20, %v629_v15  ;;  %v612_v56 = vrot.slane %v611_v2, 1  ;;  %v680_v23 = vadd.f32 %v1176_v63, %v583_v18  ;;  %v618_v45 = vrot.slane %v617_v32, 1 }
  0xfa   :  { %v660_v46 = vrot.slane %v659_v21, 1  ;;  %v666_v44 = vrot.slane %v665_v28, 1  ;;  %v692_v36 = vadd.f32 %v1181_v4, %v655_v33  ;;  %v687_v31 = vadd.f32 %v1176_v63, %v625_v22 }
  0xfb   :  { %v688_v39 = vadd.f32 %v1176_v63, %v631_v25  ;;  %v613_v40 = vadd.f32 %v612_v56, %v611_v2  ;;  %v732_v60 = vadd.f32 %v702_v55, %v690_v43  ;;  %v619_v61 = vadd.f32 %v618_v45, %v617_v32  ;;  %v807_v63 = vld [vmem:[%s1267_s0 + $0x8] sm:$0xff]  ;;  %s833_s0 = smov [#allocation2]  }
  0xfc   :  { %v661_v27 = vadd.f32 %v660_v46, %v659_v21  ;;  %v667_v5 = vadd.f32 %v666_v44, %v665_v28  ;;  %v721_v54 = vadd.f32 %v806_v6, %v679_v34  ;;  %v722_v47 = vadd.f32 %v680_v23, %v890_v29  ;;  %s788_s30 = sshll.u32 %s833_s0, 4  ;;  %s789_s30 = int_to_ptr.vmem [resolvable:$true] %s788_s30 }
  0xfd   :  { %v685_v4 = vadd.f32 %v1186_v35, %v613_v40  ;;  %v699_v33 = vrot.slane %v806_v6, 3  ;;  %v729_v49 = vadd.f32 %v807_v63, %v687_v31  ;;  %v686_v55 = vadd.f32 %v1186_v35, %v619_v61  ;;  %s808_s6 = scalar_lea.vmem %s789_s30, 256  ;;  %p813_p1 = scmp.lt.s32.totalorder %s789_s30, %s789_s30 }
  0xfe   :  { %v693_v43 = vadd.f32 %v1186_v35, %v661_v27  ;;  %v694_v48 = vadd.f32 %v1186_v35, %v667_v5  ;;  %v730_v50 = vadd.f32 %v688_v39, %v894_v30  ;;  %v700_v51 = vrot.slane %v890_v29, 3  ;;  %p809_p0 = scmp.ne.s32.totalorder %s789_s30, %s808_s6  ;;  %p814_p2 = scmp.lt.s32.totalorder %s808_s6, %s808_s6 }
  0xff   :  { %v705_v52 = vrot.slane %v807_v63, 3  ;;  %v706_v57 = vrot.slane %v894_v30, 3  ;;  %v727_v42 = vadd.f32 %v699_v33, %v685_v4  ;;  %v697_v53 = vrot.slane %v806_v6, 2 }
 0x100   :  { %v698_v62 = vrot.slane %v890_v29, 2  ;;  %v703_v0 = vrot.slane %v807_v63, 2  ;;  %v728_v1 = vadd.f32 %v700_v51, %v686_v55  ;;  %v704_v9 = vrot.slane %v894_v30, 2  ;;  %p815_p3 = por %p814_p2, %p813_p1 }
 0x101   :  { %v735_v7 = vadd.f32 %v705_v52, %v693_v43  ;;  %v736_v41 = vadd.f32 %v706_v57, %v694_v48  ;;  %v725_v11 = vadd.f32 %v697_v53, %v1189_v24  ;;  %v754_v19 = vcombine.low %v1200_v38, %v1206_v37 }
 0x102   :  { %v726_v35 = vadd.f32 %v698_v62, %v1193_v58  ;;  %v733_v13 = vadd.f32 %v703_v0, %v1196_v3  ;;  %v734_v15 = vadd.f32 %v704_v9, %v692_v36  ;;  %v758_v59 = vcombine.low %v1208_v26, %v732_v60  ;;  %p816_p4 = pnand %p815_p3, %p809_p0 }
 0x103   :  { %v753_v17 = vcombine.low %v721_v54, %v722_v47  ;;  %v756_v8 = vcombine.low %v727_v42, %v728_v1  ;;  %v761_v10 = vrot.slane %v754_v19, 7  ;;  %v757_v12 = vcombine.low %v729_v49, %v730_v50 }
 0x104   :  { %v755_v29 = vcombine.low %v725_v11, %v726_v35  ;;  %v759_v14 = vcombine.low %v733_v13, %v734_v15  ;;  %v760_v16 = vcombine.low %v735_v7, %v736_v41  ;;  %v770_v30 = vrot.slane %v758_v59, 7 }
 0x105   :  { %v762_v24 = vsel %vm490_vm1, %v761_v10, %v753_v17  ;;  %v767_v37 = vrot.slane %v756_v8, 5 }
 0x106   :  { %v764_v20 = vrot.slane %v755_v29, 6  ;;  %v763_v58 = vsel %vm502_vm5, %v761_v10, %v762_v24  ;;  %v771_v3 = vsel %vm490_vm1, %v770_v30, %v757_v12  ;;  %v773_v2 = vrot.slane %v759_v14, 6 }
 0x107   :  { %v772_v26 = vsel %vm502_vm5, %v770_v30, %v771_v3  ;;  %v776_v21 = vrot.slane %v760_v16, 5 }
 0x108   :  { %v765_v38 = vsel %vm493_vm2, %v764_v20, %v763_v58  ;;  %v774_v32 = vsel %vm493_vm2, %v773_v2, %v772_v26 }
 0x109   :  { %v766_v18 = vsel %vm505_vm6, %v764_v20, %v765_v38  ;;  %v775_v22 = vsel %vm505_vm6, %v773_v2, %v774_v32 }
 0x10a   :  { %v768_v28 = vsel %vm496_vm3, %v767_v37, %v766_v18  ;;  %v777_v34 = vsel %vm496_vm3, %v776_v21, %v775_v22 }
 0x10b   :  { %v769_v25 = vsel %vm508_vm7, %v767_v37, %v768_v28  ;;  %v778_v56 = vsel %vm508_vm7, %v776_v21, %v777_v34 }
 0x10c   :  { %781 = vst [vmem:[#allocation2] sm:$0xff] %v769_v25  ;;  %782 = vst [vmem:[#allocation2 + $0x8] sm:$0xff] %v778_v56 }
 0x10d   :  { %819 = shalt.err (!%p816_p4)
}
 0x10e   :  { %s820_s9 = scalar_lea.hbm %s1272_s5, 256 }
 0x10f   :  { %p821_p5 = scmp.ne.s32.totalorder %s1272_s5, %s820_s9  ;;  %p824_p6 = scmp.lt.u32.totalorder %s820_s9, %s1272_s5 }
 0x111   :  { %p826_p7 = pnand %p824_p6, %p821_p5 }
 0x113   :  { %829 = shalt.err (!%p826_p7)
}
 0x114   :  { %s834_s14 = smov 128   ;;  %s835_s15 = smov 8  }
 0x115   :  { %794 = dma.vmem_to_hbm [thread:$0]  %s789_s30, 256, %s1272_s5, [#allocation3], %s834_s14, %s834_s14, %s835_s15  }
 0x116   :  { %830 = dma.done.wait [#allocation3], 256  }
 0x117   :  { %831 = vsyncadd [#allocation3], 4294967040 }
 0x118   :  { %798 = vsyncpa [#allocation3], 1 }

</bundles_post_ra>
